<compile_context>
chip_gen: v7x
topology: tpu7x:2x2x1
jax: 0.10.0
libtpu: 0.0.40
codegen_flags: <defaults>
</compile_context>

<pallas_src>
import functools
import math

import jax
import jax.numpy as jnp
from jax.experimental import pallas as pl
from jax.experimental.pallas import tpu as pltpu


LN_EPS = 1e-5                  # nn.LayerNorm default
_SUBLANE = 8                   # f32 sublane count
_TM_MAX = 2048                 # max token-tile rows (amortizes ~0.35 us/step)
_TILE_VMEM_BUDGET = 16 << 20   # budget for the double-buffered x / out tiles


def _round_up(a, b):
    return (a + b - 1) // b * b


def _choose_tm(M, H, D):
    """Token-tile rows: >=2 grid steps for v7x megacore, VMEM-budgeted."""
    bytes_per_row = 4 * 2 * (H + D)          # f32 x + out tiles, double-buffered
    cap = max(_SUBLANE, (_TILE_VMEM_BUDGET // bytes_per_row) // _SUBLANE * _SUBLANE)
    cap = min(cap, _TM_MAX)
    tm = min(cap, _round_up(pl.cdiv(M, 2), _SUBLANE))   # >= 2 steps when M > 8
    return max(tm, _SUBLANE)


def _spec_head_kernel(x_ref, w1_ref, p_ref, w2_ref, b2_ref, o_ref,
                      *, approximate_gelu):
    params = p_ref[...]                      # (3, H) f32 slab: b1 / gamma / beta
    b1 = params[0:1, :]
    gamma = params[1:2, :]
    beta = params[2:3, :]

    # ---- hidden_layer: x @ W1 + b1 (bf16 MXU operands, f32 accumulate) ----
    h = jnp.dot(x_ref[...].astype(jnp.bfloat16), w1_ref[...],
                preferred_element_type=jnp.float32)
    h = h + b1

    # ---- GELU ----
    if approximate_gelu:
        h = jax.nn.gelu(h, approximate=True)           # tanh -> EUP slot
    else:
        h = 0.5 * h * (1.0 + jax.lax.erf(h * (1.0 / math.sqrt(2.0))))

    # ---- LayerNorm over hidden dim (f32 stats, centered variance) ----
    mean = jnp.mean(h, axis=-1, keepdims=True)
    hc = h - mean
    var = jnp.mean(hc * hc, axis=-1, keepdims=True)
    hn = hc * jax.lax.rsqrt(var + LN_EPS)
    hn = hn * gamma + beta

    # ---- output: hn @ W2 + b2 (bf16 MXU operands, f32 accumulate) ----
    y = jnp.dot(hn.astype(jnp.bfloat16), w2_ref[...],
                preferred_element_type=jnp.float32)
    o_ref[...] = (y + b2_ref[...]).astype(o_ref.dtype)


def _build_call(M, H, D, TM, approximate_gelu, single_buffer_consts):
    grid = (pl.cdiv(M, TM),)

    def const_spec(shape):
        idx = lambda i, _shape=shape: (0,) * len(_shape)
        if single_buffer_consts:
            return pl.BlockSpec(shape, idx, pipeline_mode=pl.Buffered(1))
        return pl.BlockSpec(shape, idx)

    cost = pl.CostEstimate(
        flops=2 * M * H * (H + D),
        transcendentals=M * H,
        bytes_accessed=4 * M * (H + D) + 2 * H * (H + D) + 4 * (3 * H + D),
    )

    vmem_limit = min(
        max(2 * 4 * TM * (H + D)            # double-buffered f32 x / out tiles
            + 2 * 2 * H * (H + D)           # bf16 W1 / W2 buffers
            + 2 * 4 * (3 * H + D)           # f32 param slab + b2 buffers
            + (4 << 20),                    # headroom
            8 << 20),
        48 << 20)                           # v7x-safe scoped ceiling

    kernel = functools.partial(_spec_head_kernel,
                               approximate_gelu=approximate_gelu)

    return pl.pallas_call(
        kernel,
        out_shape=jax.ShapeDtypeStruct((M, D), jnp.float32),
        grid=grid,
        in_specs=[
            pl.BlockSpec((TM, H), lambda i: (i, 0)),    # x token tile (pipelined)
            const_spec((H, H)),                         # W1 (in,out) bf16, resident
            const_spec((3, H)),                         # [b1; gamma; beta] f32
            const_spec((H, D)),                         # W2 (in,out) bf16, resident
            const_spec((1, D)),                         # b2 f32
        ],
        out_specs=pl.BlockSpec((TM, D), lambda i: (i, 0)),
        compiler_params=pltpu.CompilerParams(
            dimension_semantics=("parallel",),          # v7x: shard tiles over 2 TCs
            vmem_limit_bytes=int(vmem_limit),
        ),
        cost_estimate=cost,
    )


def spec_prediction_head(x, w1, b1, gamma, beta, w2, b2, *,
                         approximate_gelu=False):
    """Fused SpecPredictionHead forward.

    x: (B, S, H) float32.  w1: (H, H), w2: (H, D) pre-transposed as
    (in_features, out_features).  Returns (B, S, D) float32.
    """
    B, S, H = x.shape
    D = w2.shape[1]
    M = B * S
    TM = _choose_tm(M, H, D)

    xf = x.reshape(M, H)                                     # row-major view, no copy
    w1_bf = w1.astype(jnp.bfloat16)                          # MXU operands in bf16
    w2_bf = w2.astype(jnp.bfloat16)
    pslab = jnp.stack([b1, gamma, beta]).astype(jnp.float32)  # (3, H) fused consts
    b2_row = b2.reshape(1, D).astype(jnp.float32)

    args = (xf, w1_bf, pslab, w2_bf, b2_row)
    try:
        out = _build_call(M, H, D, TM, approximate_gelu, True)(*args)
        out = jax.block_until_ready(out)
    except Exception:
        # pl.Buffered(1) on constant blocks not supported by this JAX build;
        # fall back to default double buffering (identical results).
        out = _build_call(M, H, D, TM, approximate_gelu, False)(*args)
    return out.reshape(B, S, D)


# ----------------------------- references ---------------------------------

def _reference_f32(x, w1, b1, gamma, beta, w2, b2):
    h = x @ w1 + b1
    h = 0.5 * h * (1.0 + jax.lax.erf(h / jnp.sqrt(2.0)))
    mean = jnp.mean(h, axis=-1, keepdims=True)
    var = jnp.mean((h - mean) ** 2, axis=-1, keepdims=True)
    hn = (h - mean) * jax.lax.rsqrt(var + LN_EPS) * gamma + beta
    return hn @ w2 + b2


def _reference_bf16_matmul(x, w1, b1, gamma, beta, w2, b2):
    # Same math with the kernel's numerics: bf16 MXU operands, f32 accumulate.
    B, S, H = x.shape
    xf = x.reshape(-1, H)
    h = jnp.dot(xf.astype(jnp.bfloat16), w1.astype(jnp.bfloat16),
                preferred_element_type=jnp.float32) + b1
    h = 0.5 * h * (1.0 + jax.lax.erf(h / jnp.sqrt(2.0)))
    mean = jnp.mean(h, axis=-1, keepdims=True)
    var = jnp.mean((h - mean) ** 2, axis=-1, keepdims=True)
    hn = (h - mean) * jax.lax.rsqrt(var + LN_EPS) * gamma + beta
    y = jnp.dot(hn.astype(jnp.bfloat16), w2.astype(jnp.bfloat16),
                preferred_element_type=jnp.float32) + b2
    return y.reshape(B, S, -1)


if __name__ == "__main__":
    # cfg.hidden_dim = 32, output_dim = cfg.input_dim = 16 (no target_dim).
    B, S, H, D = 2, 8, 32, 16

    key = jax.random.PRNGKey(0)
    kx, kw1, kb1, kw2, kb2 = jax.random.split(key, 5)

    x = jax.random.normal(kx, (B, S, H), dtype=jnp.float32)

    # PyTorch-Linear-style uniform init; weights pre-transposed (in, out).
    bound = 1.0 / math.sqrt(H)
    w1 = jax.random.uniform(kw1, (H, H), jnp.float32, -bound, bound)
    b1 = jax.random.uniform(kb1, (H,), jnp.float32, -bound, bound)
    gamma = jnp.ones((H,), jnp.float32)     # nn.LayerNorm defaults
    beta = jnp.zeros((H,), jnp.float32)
    w2 = jax.random.uniform(kw2, (H, D), jnp.float32, -bound, bound)
    b2 = jax.random.uniform(kb2, (D,), jnp.float32, -bound, bound)

    y = spec_prediction_head(x, w1, b1, gamma, beta, w2, b2)
    y = jax.block_until_ready(y)
    assert y.shape == (B, S, D)

    # Tight check against a reference with matching (bf16-operand) numerics.
    y_ref = _reference_bf16_matmul(x, w1, b1, gamma, beta, w2, b2)
    assert jnp.allclose(y, y_ref, atol=1e-3, rtol=1e-3), \
        float(jnp.max(jnp.abs(y - y_ref)))

    # Loose semantic sanity check against the pure-f32 reference.
    y_f32 = _reference_f32(x, w1, b1, gamma, beta, w2, b2)
    rel = jnp.linalg.norm(y - y_f32) / jnp.linalg.norm(y_f32)
    assert float(rel) < 5e-2, float(rel)

    print("KERNEL_OK")
</pallas_src>

<mosaic_0001>
module attributes {stable_mosaic.version = 11 : i64} {
  func.func @_spec_head_kernel(%arg0: i32, %arg1: memref<8x32xf32, #tpu.memory_space<vmem>>, %arg2: memref<32x32xbf16, #tpu.memory_space<vmem>>, %arg3: memref<3x32xf32, #tpu.memory_space<vmem>>, %arg4: memref<32x16xbf16, #tpu.memory_space<vmem>>, %arg5: memref<1x16xf32, #tpu.memory_space<vmem>>, %arg6: memref<8x16xf32, #tpu.memory_space<vmem>>) attributes {dimension_semantics = [#tpu.dimension_semantics<parallel>], iteration_bounds = array<i64: 2>, scalar_prefetch = 0 : i64, scratch_operands = 0 : i64, tpu.core_type = #tpu.core_type<tc>, window_params = [{transform_indices = @transform_0, window_bounds = array<i64: 8, 32>}, {pipeline_mode = #tpu.pipeline_mode<synchronous>, transform_indices = @transform_1, window_bounds = array<i64: 32, 32>}, {pipeline_mode = #tpu.pipeline_mode<synchronous>, transform_indices = @transform_2, window_bounds = array<i64: 3, 32>}, {pipeline_mode = #tpu.pipeline_mode<synchronous>, transform_indices = @transform_3, window_bounds = array<i64: 32, 16>}, {pipeline_mode = #tpu.pipeline_mode<synchronous>, transform_indices = @transform_4, window_bounds = array<i64: 1, 16>}, {transform_indices = @transform_5, window_bounds = array<i64: 8, 16>}]} {
    %c0 = arith.constant 0 : index
    %c0_0 = arith.constant 0 : index
    %0 = vector.load %arg3[%c0, %c0_0] : memref<3x32xf32, #tpu.memory_space<vmem>>, vector<3x32xf32>
    %1 = vector.extract_strided_slice %0 {offsets = [0, 0], sizes = [1, 32], strides = [1, 1]} : vector<3x32xf32> to vector<1x32xf32>
    %2 = vector.extract_strided_slice %0 {offsets = [1, 0], sizes = [1, 32], strides = [1, 1]} : vector<3x32xf32> to vector<1x32xf32>
    %3 = vector.extract_strided_slice %0 {offsets = [2, 0], sizes = [1, 32], strides = [1, 1]} : vector<3x32xf32> to vector<1x32xf32>
    %c0_1 = arith.constant 0 : index
    %c0_2 = arith.constant 0 : index
    %4 = vector.load %arg1[%c0_1, %c0_2] : memref<8x32xf32, #tpu.memory_space<vmem>>, vector<8x32xf32>
    %5 = arith.truncf %4 : vector<8x32xf32> to vector<8x32xbf16>
    %c0_3 = arith.constant 0 : index
    %c0_4 = arith.constant 0 : index
    %6 = vector.load %arg2[%c0_3, %c0_4] : memref<32x32xbf16, #tpu.memory_space<vmem>>, vector<32x32xbf16>
    %cst = arith.constant dense<0.000000e+00> : vector<8x32xf32>
    %7 = tpu.matmul %5, %6, %cst {dimension_numbers = #tpu.dot_dimension_numbers<[1], [0], [0], [1], [0, 0, 1, 1], [], []>} : vector<8x32xbf16>, vector<32x32xbf16>, vector<8x32xf32> -> vector<8x32xf32>
    %8 = vector.broadcast %1 : vector<1x32xf32> to vector<8x32xf32>
    %9 = arith.addf %7, %8 : vector<8x32xf32>
    %cst_5 = arith.constant 5.000000e-01 : f32
    %10 = vector.broadcast %cst_5 : f32 to vector<8x32xf32>
    %11 = arith.mulf %10, %9 : vector<8x32xf32>
    %cst_6 = arith.constant 0.707106769 : f32
    %12 = vector.broadcast %cst_6 : f32 to vector<8x32xf32>
    %13 = arith.mulf %9, %12 : vector<8x32xf32>
    %14 = math.erf %13 : vector<8x32xf32>
    %cst_7 = arith.constant 1.000000e+00 : f32
    %15 = vector.broadcast %cst_7 : f32 to vector<8x32xf32>
    %16 = arith.addf %15, %14 : vector<8x32xf32>
    %17 = arith.mulf %11, %16 : vector<8x32xf32>
    %cst_8 = arith.constant dense<0.000000e+00> : vector<8xf32>
    %18 = vector.multi_reduction <add>, %17, %cst_8 [1] : vector<8x32xf32> to vector<8xf32>
    %19 = vector.shape_cast %18 : vector<8xf32> to vector<8x1xf32>
    %cst_9 = arith.constant 3.200000e+01 : f32
    %20 = vector.broadcast %cst_9 : f32 to vector<8x1xf32>
    %21 = arith.divf %19, %20 : vector<8x1xf32>
    %22 = vector.broadcast %21 : vector<8x1xf32> to vector<8x32xf32>
    %23 = arith.subf %17, %22 : vector<8x32xf32>
    %24 = arith.mulf %23, %23 : vector<8x32xf32>
    %cst_10 = arith.constant dense<0.000000e+00> : vector<8xf32>
    %25 = vector.multi_reduction <add>, %24, %cst_10 [1] : vector<8x32xf32> to vector<8xf32>
    %26 = vector.shape_cast %25 : vector<8xf32> to vector<8x1xf32>
    %cst_11 = arith.constant 3.200000e+01 : f32
    %27 = vector.broadcast %cst_11 : f32 to vector<8x1xf32>
    %28 = arith.divf %26, %27 : vector<8x1xf32>
    %cst_12 = arith.constant 9.99999974E-6 : f32
    %29 = vector.broadcast %cst_12 : f32 to vector<8x1xf32>
    %30 = arith.addf %28, %29 : vector<8x1xf32>
    %31 = math.rsqrt %30 : vector<8x1xf32>
    %32 = vector.broadcast %31 : vector<8x1xf32> to vector<8x32xf32>
    %33 = arith.mulf %23, %32 : vector<8x32xf32>
    %34 = vector.broadcast %2 : vector<1x32xf32> to vector<8x32xf32>
    %35 = arith.mulf %33, %34 : vector<8x32xf32>
    %36 = vector.broadcast %3 : vector<1x32xf32> to vector<8x32xf32>
    %37 = arith.addf %35, %36 : vector<8x32xf32>
    %38 = arith.truncf %37 : vector<8x32xf32> to vector<8x32xbf16>
    %c0_13 = arith.constant 0 : index
    %c0_14 = arith.constant 0 : index
    %39 = vector.load %arg4[%c0_13, %c0_14] : memref<32x16xbf16, #tpu.memory_space<vmem>>, vector<32x16xbf16>
    %cst_15 = arith.constant dense<0.000000e+00> : vector<8x16xf32>
    %40 = tpu.matmul %38, %39, %cst_15 {dimension_numbers = #tpu.dot_dimension_numbers<[1], [0], [0], [1], [0, 0, 1, 1], [], []>} : vector<8x32xbf16>, vector<32x16xbf16>, vector<8x16xf32> -> vector<8x16xf32>
    %c0_16 = arith.constant 0 : index
    %c0_17 = arith.constant 0 : index
    %41 = vector.load %arg5[%c0_16, %c0_17] : memref<1x16xf32, #tpu.memory_space<vmem>>, vector<1x16xf32>
    %42 = vector.broadcast %41 : vector<1x16xf32> to vector<8x16xf32>
    %43 = arith.addf %40, %42 : vector<8x16xf32>
    %c0_18 = arith.constant 0 : index
    %c0_19 = arith.constant 0 : index
    %44 = vector.load %arg6[%c0_18, %c0_19] : memref<8x16xf32, #tpu.memory_space<vmem>>, vector<8x16xf32>
    tpu.vector_store %arg6[%c0_18, %c0_19], %43 {strides = array<i32>} : memref<8x16xf32, #tpu.memory_space<vmem>>, vector<8x16xf32>,
    return
  }
  func.func @transform_0(%arg0: i32) -> (i32, i32) {
    %c0_i32 = arith.constant 0 : i32
    %c0_i32_0 = arith.constant 0 : i32
    return %arg0, %c0_i32 : i32, i32
  }
  func.func @transform_1(%arg0: i32) -> (i32, i32) {
    %c0_i32 = arith.constant 0 : i32
    %c0_i32_0 = arith.constant 0 : i32
    %c0_i32_1 = arith.constant 0 : i32
    return %c0_i32, %c0_i32_0 : i32, i32
  }
  func.func @transform_2(%arg0: i32) -> (i32, i32) {
    %c0_i32 = arith.constant 0 : i32
    %c0_i32_0 = arith.constant 0 : i32
    %c0_i32_1 = arith.constant 0 : i32
    return %c0_i32, %c0_i32_0 : i32, i32
  }
  func.func @transform_3(%arg0: i32) -> (i32, i32) {
    %c0_i32 = arith.constant 0 : i32
    %c0_i32_0 = arith.constant 0 : i32
    %c0_i32_1 = arith.constant 0 : i32
    return %c0_i32, %c0_i32_0 : i32, i32
  }
  func.func @transform_4(%arg0: i32) -> (i32, i32) {
    %c0_i32 = arith.constant 0 : i32
    %c0_i32_0 = arith.constant 0 : i32
    %c0_i32_1 = arith.constant 0 : i32
    return %c0_i32, %c0_i32_0 : i32, i32
  }
  func.func @transform_5(%arg0: i32) -> (i32, i32) {
    %c0_i32 = arith.constant 0 : i32
    %c0_i32_0 = arith.constant 0 : i32
    return %arg0, %c0_i32 : i32, i32
  }
}

module attributes {stable_mosaic.version = 11 : i64} {
  func.func @_spec_head_kernel(%arg0: i32, %arg1: memref<8x32xf32, #tpu.memory_space<vmem>>, %arg2: memref<32x32xbf16, #tpu.memory_space<vmem>>, %arg3: memref<3x32xf32, #tpu.memory_space<vmem>>, %arg4: memref<32x16xbf16, #tpu.memory_space<vmem>>, %arg5: memref<1x16xf32, #tpu.memory_space<vmem>>, %arg6: memref<8x16xf32, #tpu.memory_space<vmem>>) attributes {dimension_semantics = [#tpu.dimension_semantics<parallel>], iteration_bounds = array<i64: 2>, scalar_prefetch = 0 : i64, scratch_operands = 0 : i64, tpu.core_type = #tpu.core_type<tc>, window_params = [{transform_indices = @transform_0, window_bounds = array<i64: 8, 32>}, {pipeline_mode = #tpu.pipeline_mode<synchronous>, transform_indices = @transform_1, window_bounds = array<i64: 32, 32>}, {pipeline_mode = #tpu.pipeline_mode<synchronous>, transform_indices = @transform_2, window_bounds = array<i64: 3, 32>}, {pipeline_mode = #tpu.pipeline_mode<synchronous>, transform_indices = @transform_3, window_bounds = array<i64: 32, 16>}, {pipeline_mode = #tpu.pipeline_mode<synchronous>, transform_indices = @transform_4, window_bounds = array<i64: 1, 16>}, {transform_indices = @transform_5, window_bounds = array<i64: 8, 16>}]} {
    %c0 = arith.constant 0 : index
    %c0_0 = arith.constant 0 : index
    %0 = vector.load %arg3[%c0, %c0_0] : memref<3x32xf32, #tpu.memory_space<vmem>>, vector<3x32xf32>
    %1 = vector.extract_strided_slice %0 {offsets = [0, 0], sizes = [1, 32], strides = [1, 1]} : vector<3x32xf32> to vector<1x32xf32>
    %2 = vector.extract_strided_slice %0 {offsets = [1, 0], sizes = [1, 32], strides = [1, 1]} : vector<3x32xf32> to vector<1x32xf32>
    %3 = vector.extract_strided_slice %0 {offsets = [2, 0], sizes = [1, 32], strides = [1, 1]} : vector<3x32xf32> to vector<1x32xf32>
    %c0_1 = arith.constant 0 : index
    %c0_2 = arith.constant 0 : index
    %4 = vector.load %arg1[%c0_1, %c0_2] : memref<8x32xf32, #tpu.memory_space<vmem>>, vector<8x32xf32>
    %5 = arith.truncf %4 : vector<8x32xf32> to vector<8x32xbf16>
    %c0_3 = arith.constant 0 : index
    %c0_4 = arith.constant 0 : index
    %6 = vector.load %arg2[%c0_3, %c0_4] : memref<32x32xbf16, #tpu.memory_space<vmem>>, vector<32x32xbf16>
    %cst = arith.constant dense<0.000000e+00> : vector<8x32xf32>
    %7 = tpu.matmul %5, %6, %cst {dimension_numbers = #tpu.dot_dimension_numbers<[1], [0], [0], [1], [0, 0, 1, 1], [], []>} : vector<8x32xbf16>, vector<32x32xbf16>, vector<8x32xf32> -> vector<8x32xf32>
    %8 = vector.broadcast %1 : vector<1x32xf32> to vector<8x32xf32>
    %9 = arith.addf %7, %8 : vector<8x32xf32>
    %cst_5 = arith.constant 5.000000e-01 : f32
    %10 = vector.broadcast %cst_5 : f32 to vector<8x32xf32>
    %11 = arith.mulf %10, %9 : vector<8x32xf32>
    %cst_6 = arith.constant 0.707106769 : f32
    %12 = vector.broadcast %cst_6 : f32 to vector<8x32xf32>
    %13 = arith.mulf %9, %12 : vector<8x32xf32>
    %14 = math.erf %13 : vector<8x32xf32>
    %cst_7 = arith.constant 1.000000e+00 : f32
    %15 = vector.broadcast %cst_7 : f32 to vector<8x32xf32>
    %16 = arith.addf %15, %14 : vector<8x32xf32>
    %17 = arith.mulf %11, %16 : vector<8x32xf32>
    %cst_8 = arith.constant dense<0.000000e+00> : vector<8xf32>
    %18 = vector.multi_reduction <add>, %17, %cst_8 [1] : vector<8x32xf32> to vector<8xf32>
    %19 = vector.shape_cast %18 : vector<8xf32> to vector<8x1xf32>
    %cst_9 = arith.constant 3.200000e+01 : f32
    %20 = vector.broadcast %cst_9 : f32 to vector<8x1xf32>
    %21 = arith.divf %19, %20 : vector<8x1xf32>
    %22 = vector.broadcast %21 : vector<8x1xf32> to vector<8x32xf32>
    %23 = arith.subf %17, %22 : vector<8x32xf32>
    %24 = arith.mulf %23, %23 : vector<8x32xf32>
    %cst_10 = arith.constant dense<0.000000e+00> : vector<8xf32>
    %25 = vector.multi_reduction <add>, %24, %cst_10 [1] : vector<8x32xf32> to vector<8xf32>
    %26 = vector.shape_cast %25 : vector<8xf32> to vector<8x1xf32>
    %cst_11 = arith.constant 3.200000e+01 : f32
    %27 = vector.broadcast %cst_11 : f32 to vector<8x1xf32>
    %28 = arith.divf %26, %27 : vector<8x1xf32>
    %cst_12 = arith.constant 9.99999974E-6 : f32
    %29 = vector.broadcast %cst_12 : f32 to vector<8x1xf32>
    %30 = arith.addf %28, %29 : vector<8x1xf32>
    %31 = math.rsqrt %30 : vector<8x1xf32>
    %32 = vector.broadcast %31 : vector<8x1xf32> to vector<8x32xf32>
    %33 = arith.mulf %23, %32 : vector<8x32xf32>
    %34 = vector.broadcast %2 : vector<1x32xf32> to vector<8x32xf32>
    %35 = arith.mulf %33, %34 : vector<8x32xf32>
    %36 = vector.broadcast %3 : vector<1x32xf32> to vector<8x32xf32>
    %37 = arith.addf %35, %36 : vector<8x32xf32>
    %38 = arith.truncf %37 : vector<8x32xf32> to vector<8x32xbf16>
    %c0_13 = arith.constant 0 : index
    %c0_14 = arith.constant 0 : index
    %39 = vector.load %arg4[%c0_13, %c0_14] : memref<32x16xbf16, #tpu.memory_space<vmem>>, vector<32x16xbf16>
    %cst_15 = arith.constant dense<0.000000e+00> : vector<8x16xf32>
    %40 = tpu.matmul %38, %39, %cst_15 {dimension_numbers = #tpu.dot_dimension_numbers<[1], [0], [0], [1], [0, 0, 1, 1], [], []>} : vector<8x32xbf16>, vector<32x16xbf16>, vector<8x16xf32> -> vector<8x16xf32>
    %c0_16 = arith.constant 0 : index
    %c0_17 = arith.constant 0 : index
    %41 = vector.load %arg5[%c0_16, %c0_17] : memref<1x16xf32, #tpu.memory_space<vmem>>, vector<1x16xf32>
    %42 = vector.broadcast %41 : vector<1x16xf32> to vector<8x16xf32>
    %43 = arith.addf %40, %42 : vector<8x16xf32>
    %c0_18 = arith.constant 0 : index
    %c0_19 = arith.constant 0 : index
    %44 = vector.load %arg6[%c0_18, %c0_19] : memref<8x16xf32, #tpu.memory_space<vmem>>, vector<8x16xf32>
    tpu.vector_store %arg6[%c0_18, %c0_19], %43 {strides = array<i32>} : memref<8x16xf32, #tpu.memory_space<vmem>>, vector<8x16xf32>,
    return
  }
  func.func @transform_0(%arg0: i32) -> (i32, i32) {
    %c0_i32 = arith.constant 0 : i32
    %c0_i32_0 = arith.constant 0 : i32
    return %arg0, %c0_i32 : i32, i32
  }
  func.func @transform_1(%arg0: i32) -> (i32, i32) {
    %c0_i32 = arith.constant 0 : i32
    %c0_i32_0 = arith.constant 0 : i32
    %c0_i32_1 = arith.constant 0 : i32
    return %c0_i32, %c0_i32_0 : i32, i32
  }
  func.func @transform_2(%arg0: i32) -> (i32, i32) {
    %c0_i32 = arith.constant 0 : i32
    %c0_i32_0 = arith.constant 0 : i32
    %c0_i32_1 = arith.constant 0 : i32
    return %c0_i32, %c0_i32_0 : i32, i32
  }
  func.func @transform_3(%arg0: i32) -> (i32, i32) {
    %c0_i32 = arith.constant 0 : i32
    %c0_i32_0 = arith.constant 0 : i32
    %c0_i32_1 = arith.constant 0 : i32
    return %c0_i32, %c0_i32_0 : i32, i32
  }
  func.func @transform_4(%arg0: i32) -> (i32, i32) {
    %c0_i32 = arith.constant 0 : i32
    %c0_i32_0 = arith.constant 0 : i32
    %c0_i32_1 = arith.constant 0 : i32
    return %c0_i32, %c0_i32_0 : i32, i32
  }
  func.func @transform_5(%arg0: i32) -> (i32, i32) {
    %c0_i32 = arith.constant 0 : i32
    %c0_i32_0 = arith.constant 0 : i32
    return %arg0, %c0_i32 : i32, i32
  }
}

</mosaic_0001>

<bundles_post_ra>
// kernel: tpu_custom_call.1
= control target key start
LH: loop header
LB: loop body
LE: loop exit
PB: predicated region body
PF: predicated region fallthrough
CT: control target
= control target key end

     0   :  { %10 = vsyncpa [#allocation3], 0  ;;  %s872_s0 = inlined_call_operand.vmem [shape: f32[16,32], index: 0, kind: input, shape index: {}]   ;;  %s873_s1 = inlined_call_operand.hbm [shape: bf16[32,32], index: 1, kind: input, shape index: {}]   ;;  %s874_s2 = inlined_call_operand.vmem [shape: f32[3,32], index: 2, kind: input, shape index: {}]   ;;  %s875_s3 = inlined_call_operand.vmem [shape: bf16[32,16], index: 3, kind: input, shape index: {}]   ;;  %s876_s4 = inlined_call_operand.vmem [shape: f32[1,16], index: 4, kind: input, shape index: {}]   ;;  %s877_s5 = inlined_call_operand.hbm [shape: f32[16,16], index: 5, kind: output, shape index: {}]  }
   0x1   :  { %11 = vsyncpa [#allocation4], 0 }
   0x2   :  { %13 = vsyncpa [#allocation4 + $0x1], 0  ;;  %s721_s18 = smov 0   ;;  %s723_s19 = smov 0  }
   0x3   :  { %s725_s20 = smov 0   ;;  %s727_s21 = smov 0  }
   0x4 LB: > { %s742_s22 = sadd.s32 4294967295, %s683_s21   ;;  %s486_s23 = sadd.s32 4294967294, %s683_s21   ;;  %s683_s21 = sphi %s727_s21, %s893_s21   ;;  %s679_s20 = sphi %s725_s20, %s892_s20   ;;  %s675_s19 = sphi %s723_s19, %s891_s19   ;;  %s671_s18 = sphi %s721_s18, %s890_s18  }
   0x5   : > { %s746_s24 = sadd.s32 1, %s683_s21   ;;  %s136_s25 = sadd.s32 1, %s679_s20 }
   0x6   : > { %s133_s26 = ssub.s32 %s683_s21, %s746_s24  ;;  %p146_p0 = scmp.ne.s32.totalorder %s679_s20, %s675_s19 }
   0x7   : > { %p134_p1 = scmp.eq.s32.totalorder %s133_s26, 0  ;;  %p147_p2 = scmp.eq.s32.totalorder %s742_s22, 1 }
   0x8   : > { %p152_p3 = scmp.ne.s32.totalorder %s675_s19, %s671_s18  ;;  %p153_p4 = scmp.eq.s32.totalorder %s486_s23, 1 }
   0x9   : > { %s757_s27 = scalar_select %p134_p1, %s679_s20, %s136_s25  }
   0xa   : > { %p759_p5 = por %p147_p2, %p146_p0  ;;  %p763_p6 = por %p153_p4, %p152_p3 }
   0xb   : > { %p487_p7 = scmp.ge.s32.totalorder %s683_s21, 1  ;;  %p160_p8 = scmp.lt.s32.totalorder %s683_s21, 3 }
   0xc   : > { %s881_s28 = scalar_select %p759_p5, 1, 0 }
   0xd   : > { %s882_s29 = scalar_select %p763_p6, 1, 0 }
   0xe   : > { %p878_p9 = scmp.eq.s32.totalorder %s742_s22, 0  ;;  %p770_p10 = pnand %p487_p7, %p160_p8 }
   0xf   : > { %s685_s6 = smov [#allocation2]   ;;  %s589_s11 = scalar_lea.hbm %s873_s1, 256 }
  0x10   : > { %s883_s30 = scalar_select %p770_p10, 1, 0 }
  0x11   : > { %s172_s7 = sshll.u32 %s685_s6, 4  ;;  %p533_p11 = pneg %p770_p10  ;;  %s173_s7 = int_to_ptr.vmem [resolvable:$true] %s172_s7 }
  0x12   : > { %p590_p13 = scmp.ne.s32.totalorder %s873_s1, %s589_s11  ;;  %p596_p3 = scmp.lt.u32.totalorder %s589_s11, %s873_s1 }
  0x13   : > { %p778_p12 = pnand %p878_p9, %p533_p11 }
  0x15   : > { %p591_p0 = pneg %p778_p12 }
  0x17   : > { %p592_p1 = pnand %p591_p0, %p590_p13 }
  0x19   : > { %p593_p2 = pneg %p592_p1 }
  0x1b   : > { %p598_p4 = pnand %p596_p3, %p593_p2 }
  0x1d   : > { %601 = shalt.err (!%p598_p4)
}
  0x1e   : > { %s602_s16 = scalar_lea.vmem %s173_s7, 256  ;;  %p610_p9 = scmp.lt.s32.totalorder %s173_s7, %s173_s7 }
  0x1f   : > { %p603_p7 = scmp.ne.s32.totalorder %s173_s7, %s602_s16  ;;  %p611_p6 = scmp.lt.s32.totalorder %s602_s16, %s602_s16 }
  0x21   : > { %p605_p8 = pnand %p603_p7, %p591_p0  ;;  %p612_p5 = por %p611_p6, %p610_p9 }
  0x23   : > { %p606_p11 = pneg %p605_p8 }
  0x25   : > { %p613_p10 = pnand %p612_p5, %p606_p11 }
  0x27   : > { %616 = shalt.err (!%p613_p10)
}
  0x28   : > { %s686_s17 = smov 64   ;;  %s687_s23 = smov 4  }
  0x29   : > { %536 = dma.hbm_to_vmem [thread:$0]  (!%p778_p12), %s873_s1, 256, %s173_s7, [#allocation3], %s686_s17, %s686_s17, %s687_s23  }
  0x2a   : > { %p885_p13 = scmp.ne.s32.totalorder %s883_s30, 0 }
  0x2b   : > { %p886_p1 = scmp.eq.s32.totalorder (!%p885_p13), %s742_s22, 0 }
  0x2c   : > { %204 = sbr.rel (%p885_p13) target bundleno = 836 (0x344), region = 40 }
  0x33   : > { %662 = dma.done.wait (%p886_p1), [#allocation3], 256   ;;  %p887_p0 = pmov %p886_p1 }
  0x34   : > { %p231_p5 = scmp.lt.s32.totalorder %s742_s22, 1  ;;  %v688_v0 = vmov 0.0   ;;  %vm689_vm0 = vmmov 0   ;;  %v581_v1 = vld [vmem:[#allocation2] sm:$0xff]   ;;  %v582_v2 = vld [vmem:[#allocation2 + $0x8] sm:$0xff]   ;;  %vm259_vm1 = vcmask 261120   ;;  %v243_v5 = vlaneseq }
  0x35   : > { %664 = vsyncadd (%p887_p0), [#allocation3], 4294967040  ;;  %511 = vmatprep.subr.bf16.mxu0 %v688_v0  ;;  %515 = vmatprep.mubr.msk.bf16.mxu0 %vm689_vm0, %v688_v0  ;;  %v236_v8 = vld [vmem:[%s874_s2] sm:$0x7]  ;;  %v584_v27 = vld [vmem:[%s875_s3 + $0x8] sm:$0xff]   ;;  %s228_s16 = sand.u32 1, %s675_s19  }
  0x36   : > { %s232_s6 = scalar_select %p231_p5, %s742_s22, 1  ;;  %519 = vmatprep.subr.bf16.mxu1 %v688_v0  ;;  %523 = vmatprep.mubr.msk.bf16.mxu1 %vm689_vm0, %v688_v0  ;;  %v244_v6 = vshrl.u32 %v243_v5, 7  ;;  %v583_v26 = vld [vmem:[%s875_s3] sm:$0xff]   ;;  %vm399_vm2 = vcmask 130048  }
  0x37   : > { %512 = vmatpush3.bf16.msra.mxu0 %v581_v1  ;;  %520 = vmatpush3.bf16.msra.mxu1 %v583_v26  ;;  %s492_s17 = sshll.u32 %s228_s16, 3  ;;  %v497_v40 = vld [vmem:[%s876_s4] ss:$0 sm:$0xff]  ;;  %s502_s26 = sshll.u32 %s742_s22, 7 }
  0x38   : > { %s493_s7 = sshll.u32 %s232_s6, 3  ;;  %513 = vmatprep.subr.bf16.mxu0 %v688_v0  ;;  %v245_v7 = vsub.s32 0, %v244_v6  ;;  %521 = vmatprep.subr.bf16.mxu1 %v688_v0  ;;  %v324_v31 = vsub.s32 1, %v244_v6  ;;  %v329_v32 = vsub.s32 2, %v244_v6  ;;  %s230_s6 = scalar_lea.vmem [#allocation5], %s492_s17 }
  0x39   : > { %s234_s9 = scalar_lea.vmem %s872_s0, %s493_s7  ;;  %s415_s7 = sshll.u32 %s230_s6, 4  ;;  %s832_s7 = int_to_ptr.vmem [resolvable:$true] %s415_s7 }
  0x3a   : > { %v237_v3 = vld [vmem:[%s234_s9] sm:$0xff]  ;;  %v246_v9 = vrot.slane %v236_v8, %v245_v7  ;;  %v325_v33 = vrot.slane %v236_v8, %v324_v31  ;;  %v330_v35 = vrot.slane %v236_v8, %v329_v32  ;;  %s830_s9 = scalar_lea.hbm %s877_s5, %s502_s26  ;;  %s402_s22 = scalar_lea.sflag [#allocation4], %s228_s16 }
  0x3b   : > { %v238_v4 = vpack.c.bf16 %v237_v3, %v237_v3  ;;  %514 = vmatpush3.bf16.msra.mxu0 %v582_v2  ;;  %522 = vmatpush3.bf16.msra.mxu1 %v584_v27  ;;  %s617_s10 = scalar_lea.vmem %s832_s7, 128  ;;  %p888_p9 = scmp.ne.s32.totalorder %s881_s28, 0 }
  0x3c   : > { %p618_p6 = scmp.ne.s32.totalorder %s832_s7, %s617_s10  ;;  %s690_s11 = smov [#allocation5]  }
  0x3d   : > { %s621_s12 = sshll.u32 %s690_s11, 4  ;;  %s622_s12 = int_to_ptr.vmem [resolvable:$false] %s621_s12 }
  0x3e   : > { %516 = vmatmul.mubr.msk.bf16.vlgmr.msra.gmra.mrb[0].mxu0 %vm259_vm1, %v238_v4  ;;  %p619_p10 = pnand %p618_p6, %p888_p9  ;;  %s623_s13 = scalar_lea.vmem %s622_s12, 256 }
  0x3f   : > { %p624_p2 = scmp.lt.s32.totalorder %s832_s7, %s622_s12  ;;  %p625_p3 = scmp.lt.s32.totalorder %s623_s13, %s617_s10 }
  0x40   : > { %p620_p12 = pneg %p619_p10 }
  0x41   : > { %p626_p4 = por %p625_p3, %p624_p2 }
  0x43   : > { %p627_p7 = pnand %p626_p4, %p620_p12 }
 0x111   : > { %v297_v10 = vpop.f32.mrb[0].mxu0 }
 0x112   : > { %v298_v11 = vadd.f32 %v297_v10, %v246_v9  ;;  %v517_v12 = vpop.f32.mrb[1].mxu0 }
 0x113   : > { %v300_v13 = vpop.f32.mrb[2].mxu0 }
 0x114   : > { %v304_v14 = vmul.f32 0.70710677, %v298_v11  ;;  %v518_v15 = vpop.f32.mrb[3].mxu0  ;;  %v303_v17 = vmul.f32 0.5, %v298_v11 }
 0x116   : > { %585 = verf.f32 %v304_v14 }
 0x120   : > { %v586_v16 = vpop.eup %585 }
 0x121   : > { %v306_v18 = vadd.f32 1.0, %v586_v16 }
 0x123   : > { %v307_v19 = vmul.f32 %v306_v18, %v303_v17 }
 0x125   : > { %v308_v20 = vsel %vm259_vm1, %v307_v19, 0.0 }
 0x126   : > { %309 = vadd.xlane.f32.xlu0 %v308_v20 }
 0x1b3   : > { %v310_v21 = vpop.xlane.xlu0 %309 }
 0x1b4   : > { %v312_v22 = vmul.f32 0.03125, %v310_v21 }
 0x1b6   : > { %v313_v23 = vsub.f32 %v307_v19, %v312_v22 }
 0x1b8   : > { %v314_v24 = vmul.f32 %v313_v23, %v313_v23 }
 0x1ba   : > { %v315_v25 = vsel %vm259_vm1, %v314_v24, 0.0 }
 0x1bb   : > { %316 = vadd.xlane.f32.xlu0 %v315_v25 }
 0x248   : > { %v317_v28 = vpop.xlane.xlu0 %316 }
 0x249   : > { %v318_v29 = vmul.f32 0.03125, %v317_v28 }
 0x24b   : > { %v319_v30 = vadd.f32 1e-05, %v318_v29 }
 0x24d   : > { %587 = vrsqrt.f32 %v319_v30 }
 0x257   : > { %v588_v34 = vpop.eup %587 }
 0x258   : > { %v321_v36 = vmul.f32 %v588_v34, %v313_v23 }
 0x25a   : > { %v326_v37 = vmul.f32 %v325_v33, %v321_v36 }
 0x25c   : > { %v331_v38 = vadd.f32 %v330_v35, %v326_v37 }
 0x25e   : > { %v332_v39 = vpack.c.bf16 %v331_v38, %v331_v38 }
 0x260   : > { %524 = vmatmul.mubr.msk.bf16.vlgmr.msra.gmra.mrb[0].mxu1 %vm259_vm1, %v332_v39 }
 0x333   : > { %v393_v41 = vpop.f32.mrb[0].mxu1 }
 0x334   : > { %v394_v42 = vadd.f32 %v497_v40, %v393_v41  ;;  %v525_v43 = vpop.f32.mrb[1].mxu1 }
 0x335   : > { %v396_v44 = vpop.f32.mrb[2].mxu1 }
 0x336   : > { %v526_v45 = vpop.f32.mrb[3].mxu1  ;;  %400 = vst.msk [vmem:[%s230_s6] sm:$0xff] %vm399_vm2, %v394_v42 }
 0x337   : > { %630 = shalt.err (!%p627_p7)
}
 0x338   : > { %s631_s14 = scalar_lea.hbm %s830_s9, 128  ;;  %s635_s17 = scalar_lea.hbm %s877_s5, 256 }
 0x339   : > { %p632_p8 = scmp.ne.s32.totalorder %s830_s9, %s631_s14  ;;  %p636_p1 = scmp.lt.u32.totalorder %s830_s9, %s877_s5 }
 0x33a   : > { %p637_p0 = scmp.lt.u32.totalorder %s635_s17, %s631_s14  ;;  %p639_p6 = scmp.lt.u32.totalorder %s631_s14, %s830_s9 }
 0x33b   : > { %p633_p11 = pnand %p632_p8, %p888_p9 }
 0x33c   : > { %p638_p5 = por %p637_p0, %p636_p1 }
 0x33d   : > { %p634_p13 = pneg %p633_p11 }
 0x33e   : > { %p640_p10 = por %p639_p6, %p638_p5 }
 0x340   : > { %p641_p12 = pnand %p640_p10, %p634_p13 }
 0x342   : > { %644 = shalt.err (!%p641_p12)
}
 0x343   : > { %531 = dma.vmem_to_hbm [thread:$0]  (%p888_p9), %s832_s7, 128, %s830_s9, %s402_s22  }
 0x344 PF: > { %p543_p2 = scmp.ge.s32.totalorder %s683_s21, 2  ;;  %s427_s26 = sand.u32 1, %s671_s18  }
 0x345   : > { %p889_p3 = scmp.ne.s32.totalorder %s882_s29, 0  ;;  %s428_s6 = scalar_lea.sflag [#allocation4], %s427_s26 }
 0x347   : > { %p538_p4 = pnand %p543_p2, %p889_p3 }
 0x349   : > { %666 = dma.done.wait (!%p538_p4), %s428_s6, 128  }
 0x34a   : > { %668 = vsyncadd (!%p538_p4), %s428_s6, 4294967168  ;;  %p16_p7 = scmp.ge.s32.totalorder %s746_s24, 4   ;;  %s890_s18 = smov %s675_s19 }
 0x34b   : > { %s891_s19 = smov %s679_s20  ;;  %s892_s20 = smov %s757_s27 }
 0x34c   : > { %s893_s21 = smov %s746_s24  ;;  %18 = sbr.rel (!%p16_p7) target bundleno = 4 (0x4), region = 80 }
 0x353   :  { %433 = vsyncpa [#allocation3], 1 }
 0x354   :  { %435 = vsyncpa [#allocation3 + $0x1], 1 }
 0x355   :  { %436 = vsyncpa [#allocation4], 1 }
 0x356   :  { %438 = vsyncpa [#allocation4 + $0x1], 1 }

// kernel: tpu_custom_call.1
= control target key start
LH: loop header
LB: loop body
LE: loop exit
PB: predicated region body
PF: predicated region fallthrough
CT: control target
= control target key end

     0   :  { %10 = vsyncpa [#allocation3], 0  ;;  %s872_s0 = inlined_call_operand.vmem [shape: f32[16,32], index: 0, kind: input, shape index: {}]   ;;  %s873_s1 = inlined_call_operand.hbm [shape: bf16[32,32], index: 1, kind: input, shape index: {}]   ;;  %s874_s2 = inlined_call_operand.vmem [shape: f32[3,32], index: 2, kind: input, shape index: {}]   ;;  %s875_s3 = inlined_call_operand.vmem [shape: bf16[32,16], index: 3, kind: input, shape index: {}]   ;;  %s876_s4 = inlined_call_operand.vmem [shape: f32[1,16], index: 4, kind: input, shape index: {}]   ;;  %s877_s5 = inlined_call_operand.hbm [shape: f32[16,16], index: 5, kind: output, shape index: {}]  }
   0x1   :  { %11 = vsyncpa [#allocation4], 0 }
   0x2   :  { %13 = vsyncpa [#allocation4 + $0x1], 0  ;;  %s721_s18 = smov 0   ;;  %s723_s19 = smov 0  }
   0x3   :  { %s725_s20 = smov 0   ;;  %s727_s21 = smov 0  }
   0x4 LB: > { %s742_s22 = sadd.s32 4294967295, %s683_s21   ;;  %s486_s23 = sadd.s32 4294967294, %s683_s21   ;;  %s683_s21 = sphi %s727_s21, %s893_s21   ;;  %s679_s20 = sphi %s725_s20, %s892_s20   ;;  %s675_s19 = sphi %s723_s19, %s891_s19   ;;  %s671_s18 = sphi %s721_s18, %s890_s18  }
   0x5   : > { %s746_s24 = sadd.s32 1, %s683_s21   ;;  %s136_s25 = sadd.s32 1, %s679_s20 }
   0x6   : > { %s133_s26 = ssub.s32 %s683_s21, %s746_s24  ;;  %p146_p0 = scmp.ne.s32.totalorder %s679_s20, %s675_s19 }
   0x7   : > { %p134_p1 = scmp.eq.s32.totalorder %s133_s26, 0  ;;  %p147_p2 = scmp.eq.s32.totalorder %s742_s22, 1 }
   0x8   : > { %p152_p3 = scmp.ne.s32.totalorder %s675_s19, %s671_s18  ;;  %p153_p4 = scmp.eq.s32.totalorder %s486_s23, 1 }
   0x9   : > { %s757_s27 = scalar_select %p134_p1, %s679_s20, %s136_s25  }
   0xa   : > { %p759_p5 = por %p147_p2, %p146_p0  ;;  %p763_p6 = por %p153_p4, %p152_p3 }
   0xb   : > { %p487_p7 = scmp.ge.s32.totalorder %s683_s21, 1  ;;  %p160_p8 = scmp.lt.s32.totalorder %s683_s21, 3 }
   0xc   : > { %s881_s28 = scalar_select %p759_p5, 1, 0 }
   0xd   : > { %s882_s29 = scalar_select %p763_p6, 1, 0 }
   0xe   : > { %p878_p9 = scmp.eq.s32.totalorder %s742_s22, 0  ;;  %p770_p10 = pnand %p487_p7, %p160_p8 }
   0xf   : > { %s685_s6 = smov [#allocation2]   ;;  %s589_s11 = scalar_lea.hbm %s873_s1, 256 }
  0x10   : > { %s883_s30 = scalar_select %p770_p10, 1, 0 }
  0x11   : > { %s172_s7 = sshll.u32 %s685_s6, 4  ;;  %p533_p11 = pneg %p770_p10  ;;  %s173_s7 = int_to_ptr.vmem [resolvable:$true] %s172_s7 }
  0x12   : > { %p590_p13 = scmp.ne.s32.totalorder %s873_s1, %s589_s11  ;;  %p596_p3 = scmp.lt.u32.totalorder %s589_s11, %s873_s1 }
  0x13   : > { %p778_p12 = pnand %p878_p9, %p533_p11 }
  0x15   : > { %p591_p0 = pneg %p778_p12 }
  0x17   : > { %p592_p1 = pnand %p591_p0, %p590_p13 }
  0x19   : > { %p593_p2 = pneg %p592_p1 }
  0x1b   : > { %p598_p4 = pnand %p596_p3, %p593_p2 }
  0x1d   : > { %601 = shalt.err (!%p598_p4)
}
  0x1e   : > { %s602_s16 = scalar_lea.vmem %s173_s7, 256  ;;  %p610_p9 = scmp.lt.s32.totalorder %s173_s7, %s173_s7 }
  0x1f   : > { %p603_p7 = scmp.ne.s32.totalorder %s173_s7, %s602_s16  ;;  %p611_p6 = scmp.lt.s32.totalorder %s602_s16, %s602_s16 }
  0x21   : > { %p605_p8 = pnand %p603_p7, %p591_p0  ;;  %p612_p5 = por %p611_p6, %p610_p9 }
  0x23   : > { %p606_p11 = pneg %p605_p8 }
  0x25   : > { %p613_p10 = pnand %p612_p5, %p606_p11 }
  0x27   : > { %616 = shalt.err (!%p613_p10)
}
  0x28   : > { %s686_s17 = smov 64   ;;  %s687_s23 = smov 4  }
  0x29   : > { %536 = dma.hbm_to_vmem [thread:$0]  (!%p778_p12), %s873_s1, 256, %s173_s7, [#allocation3], %s686_s17, %s686_s17, %s687_s23  }
  0x2a   : > { %p885_p13 = scmp.ne.s32.totalorder %s883_s30, 0 }
  0x2b   : > { %p886_p1 = scmp.eq.s32.totalorder (!%p885_p13), %s742_s22, 0 }
  0x2c   : > { %204 = sbr.rel (%p885_p13) target bundleno = 836 (0x344), region = 40 }
  0x33   : > { %662 = dma.done.wait (%p886_p1), [#allocation3], 256   ;;  %p887_p0 = pmov %p886_p1 }
  0x34   : > { %p231_p5 = scmp.lt.s32.totalorder %s742_s22, 1  ;;  %v688_v0 = vmov 0.0   ;;  %vm689_vm0 = vmmov 0   ;;  %v581_v1 = vld [vmem:[#allocation2] sm:$0xff]   ;;  %v582_v2 = vld [vmem:[#allocation2 + $0x8] sm:$0xff]   ;;  %vm259_vm1 = vcmask 261120   ;;  %v243_v5 = vlaneseq }
  0x35   : > { %664 = vsyncadd (%p887_p0), [#allocation3], 4294967040  ;;  %511 = vmatprep.subr.bf16.mxu0 %v688_v0  ;;  %515 = vmatprep.mubr.msk.bf16.mxu0 %vm689_vm0, %v688_v0  ;;  %v236_v8 = vld [vmem:[%s874_s2] sm:$0x7]  ;;  %v584_v27 = vld [vmem:[%s875_s3 + $0x8] sm:$0xff]   ;;  %s228_s16 = sand.u32 1, %s675_s19  }
  0x36   : > { %s232_s6 = scalar_select %p231_p5, %s742_s22, 1  ;;  %519 = vmatprep.subr.bf16.mxu1 %v688_v0  ;;  %523 = vmatprep.mubr.msk.bf16.mxu1 %vm689_vm0, %v688_v0  ;;  %v244_v6 = vshrl.u32 %v243_v5, 7  ;;  %v583_v26 = vld [vmem:[%s875_s3] sm:$0xff]   ;;  %vm399_vm2 = vcmask 130048  }
  0x37   : > { %512 = vmatpush3.bf16.msra.mxu0 %v581_v1  ;;  %520 = vmatpush3.bf16.msra.mxu1 %v583_v26  ;;  %s492_s17 = sshll.u32 %s228_s16, 3  ;;  %v497_v40 = vld [vmem:[%s876_s4] ss:$0 sm:$0xff]  ;;  %s502_s26 = sshll.u32 %s742_s22, 7 }
  0x38   : > { %s493_s7 = sshll.u32 %s232_s6, 3  ;;  %513 = vmatprep.subr.bf16.mxu0 %v688_v0  ;;  %v245_v7 = vsub.s32 0, %v244_v6  ;;  %521 = vmatprep.subr.bf16.mxu1 %v688_v0  ;;  %v324_v31 = vsub.s32 1, %v244_v6  ;;  %v329_v32 = vsub.s32 2, %v244_v6  ;;  %s230_s6 = scalar_lea.vmem [#allocation5], %s492_s17 }
  0x39   : > { %s234_s9 = scalar_lea.vmem %s872_s0, %s493_s7  ;;  %s415_s7 = sshll.u32 %s230_s6, 4  ;;  %s832_s7 = int_to_ptr.vmem [resolvable:$true] %s415_s7 }
  0x3a   : > { %v237_v3 = vld [vmem:[%s234_s9] sm:$0xff]  ;;  %v246_v9 = vrot.slane %v236_v8, %v245_v7  ;;  %v325_v33 = vrot.slane %v236_v8, %v324_v31  ;;  %v330_v35 = vrot.slane %v236_v8, %v329_v32  ;;  %s830_s9 = scalar_lea.hbm %s877_s5, %s502_s26  ;;  %s402_s22 = scalar_lea.sflag [#allocation4], %s228_s16 }
  0x3b   : > { %v238_v4 = vpack.c.bf16 %v237_v3, %v237_v3  ;;  %514 = vmatpush3.bf16.msra.mxu0 %v582_v2  ;;  %522 = vmatpush3.bf16.msra.mxu1 %v584_v27  ;;  %s617_s10 = scalar_lea.vmem %s832_s7, 128  ;;  %p888_p9 = scmp.ne.s32.totalorder %s881_s28, 0 }
  0x3c   : > { %p618_p6 = scmp.ne.s32.totalorder %s832_s7, %s617_s10  ;;  %s690_s11 = smov [#allocation5]  }
  0x3d   : > { %s621_s12 = sshll.u32 %s690_s11, 4  ;;  %s622_s12 = int_to_ptr.vmem [resolvable:$false] %s621_s12 }
  0x3e   : > { %516 = vmatmul.mubr.msk.bf16.vlgmr.msra.gmra.mrb[0].mxu0 %vm259_vm1, %v238_v4  ;;  %p619_p10 = pnand %p618_p6, %p888_p9  ;;  %s623_s13 = scalar_lea.vmem %s622_s12, 256 }
  0x3f   : > { %p624_p2 = scmp.lt.s32.totalorder %s832_s7, %s622_s12  ;;  %p625_p3 = scmp.lt.s32.totalorder %s623_s13, %s617_s10 }
  0x40   : > { %p620_p12 = pneg %p619_p10 }
  0x41   : > { %p626_p4 = por %p625_p3, %p624_p2 }
  0x43   : > { %p627_p7 = pnand %p626_p4, %p620_p12 }
 0x111   : > { %v297_v10 = vpop.f32.mrb[0].mxu0 }
 0x112   : > { %v298_v11 = vadd.f32 %v297_v10, %v246_v9  ;;  %v517_v12 = vpop.f32.mrb[1].mxu0 }
 0x113   : > { %v300_v13 = vpop.f32.mrb[2].mxu0 }
 0x114   : > { %v304_v14 = vmul.f32 0.70710677, %v298_v11  ;;  %v518_v15 = vpop.f32.mrb[3].mxu0  ;;  %v303_v17 = vmul.f32 0.5, %v298_v11 }
 0x116   : > { %585 = verf.f32 %v304_v14 }
 0x120   : > { %v586_v16 = vpop.eup %585 }
 0x121   : > { %v306_v18 = vadd.f32 1.0, %v586_v16 }
 0x123   : > { %v307_v19 = vmul.f32 %v306_v18, %v303_v17 }
 0x125   : > { %v308_v20 = vsel %vm259_vm1, %v307_v19, 0.0 }
 0x126   : > { %309 = vadd.xlane.f32.xlu0 %v308_v20 }
 0x1b3   : > { %v310_v21 = vpop.xlane.xlu0 %309 }
 0x1b4   : > { %v312_v22 = vmul.f32 0.03125, %v310_v21 }
 0x1b6   : > { %v313_v23 = vsub.f32 %v307_v19, %v312_v22 }
 0x1b8   : > { %v314_v24 = vmul.f32 %v313_v23, %v313_v23 }
 0x1ba   : > { %v315_v25 = vsel %vm259_vm1, %v314_v24, 0.0 }
 0x1bb   : > { %316 = vadd.xlane.f32.xlu0 %v315_v25 }
 0x248   : > { %v317_v28 = vpop.xlane.xlu0 %316 }
 0x249   : > { %v318_v29 = vmul.f32 0.03125, %v317_v28 }
 0x24b   : > { %v319_v30 = vadd.f32 1e-05, %v318_v29 }
 0x24d   : > { %587 = vrsqrt.f32 %v319_v30 }
 0x257   : > { %v588_v34 = vpop.eup %587 }
 0x258   : > { %v321_v36 = vmul.f32 %v588_v34, %v313_v23 }
 0x25a   : > { %v326_v37 = vmul.f32 %v325_v33, %v321_v36 }
 0x25c   : > { %v331_v38 = vadd.f32 %v330_v35, %v326_v37 }
 0x25e   : > { %v332_v39 = vpack.c.bf16 %v331_v38, %v331_v38 }
 0x260   : > { %524 = vmatmul.mubr.msk.bf16.vlgmr.msra.gmra.mrb[0].mxu1 %vm259_vm1, %v332_v39 }
 0x333   : > { %v393_v41 = vpop.f32.mrb[0].mxu1 }
 0x334   : > { %v394_v42 = vadd.f32 %v497_v40, %v393_v41  ;;  %v525_v43 = vpop.f32.mrb[1].mxu1 }
 0x335   : > { %v396_v44 = vpop.f32.mrb[2].mxu1 }
 0x336   : > { %v526_v45 = vpop.f32.mrb[3].mxu1  ;;  %400 = vst.msk [vmem:[%s230_s6] sm:$0xff] %vm399_vm2, %v394_v42 }
 0x337   : > { %630 = shalt.err (!%p627_p7)
}
 0x338   : > { %s631_s14 = scalar_lea.hbm %s830_s9, 128  ;;  %s635_s17 = scalar_lea.hbm %s877_s5, 256 }
 0x339   : > { %p632_p8 = scmp.ne.s32.totalorder %s830_s9, %s631_s14  ;;  %p636_p1 = scmp.lt.u32.totalorder %s830_s9, %s877_s5 }
 0x33a   : > { %p637_p0 = scmp.lt.u32.totalorder %s635_s17, %s631_s14  ;;  %p639_p6 = scmp.lt.u32.totalorder %s631_s14, %s830_s9 }
 0x33b   : > { %p633_p11 = pnand %p632_p8, %p888_p9 }
 0x33c   : > { %p638_p5 = por %p637_p0, %p636_p1 }
 0x33d   : > { %p634_p13 = pneg %p633_p11 }
 0x33e   : > { %p640_p10 = por %p639_p6, %p638_p5 }
 0x340   : > { %p641_p12 = pnand %p640_p10, %p634_p13 }
 0x342   : > { %644 = shalt.err (!%p641_p12)
}
 0x343   : > { %531 = dma.vmem_to_hbm [thread:$0]  (%p888_p9), %s832_s7, 128, %s830_s9, %s402_s22  }
 0x344 PF: > { %p543_p2 = scmp.ge.s32.totalorder %s683_s21, 2  ;;  %s427_s26 = sand.u32 1, %s671_s18  }
 0x345   : > { %p889_p3 = scmp.ne.s32.totalorder %s882_s29, 0  ;;  %s428_s6 = scalar_lea.sflag [#allocation4], %s427_s26 }
 0x347   : > { %p538_p4 = pnand %p543_p2, %p889_p3 }
 0x349   : > { %666 = dma.done.wait (!%p538_p4), %s428_s6, 128  }
 0x34a   : > { %668 = vsyncadd (!%p538_p4), %s428_s6, 4294967168  ;;  %p16_p7 = scmp.ge.s32.totalorder %s746_s24, 4   ;;  %s890_s18 = smov %s675_s19 }
 0x34b   : > { %s891_s19 = smov %s679_s20  ;;  %s892_s20 = smov %s757_s27 }
 0x34c   : > { %s893_s21 = smov %s746_s24  ;;  %18 = sbr.rel (!%p16_p7) target bundleno = 4 (0x4), region = 80 }
 0x353   :  { %433 = vsyncpa [#allocation3], 1 }
 0x354   :  { %435 = vsyncpa [#allocation3 + $0x1], 1 }
 0x355   :  { %436 = vsyncpa [#allocation4], 1 }
 0x356   :  { %438 = vsyncpa [#allocation4 + $0x1], 1 }

</bundles_post_ra>
